<compile_context>
chip_gen: v5e
topology: v5e:2x2
jax: 0.10.0
libtpu: 0.0.40
codegen_flags: <defaults>
</compile_context>

<pallas_src>
import math

import jax
import jax.numpy as jnp
from jax.experimental import pallas as pl
from jax.experimental.pallas import tpu as pltpu


def _round_up(x, m):
    return (x + m - 1) // m * m


def _default_tile_rows():
    """256 rows for v6e/v7x-class parts, 128 for v5e (smaller MXU, no bf16 VPU)."""
    try:
        kind = jax.devices()[0].device_kind.lower()
    except Exception:
        return 256
    if "v5 lite" in kind or "v5e" in kind or "v5lite" in kind:
        return 128
    return 256


def _make_spec_head_kernel(h_valid, h_padded, eps):
    inv_h = 1.0 / float(h_valid)

    def kernel(x_ref, w1_ref, b1_ref, gamma_ref, beta_ref, w2_ref, b2_ref,
               out_ref, hid_ref):
        # Matmul operands stay in their native (input) dtype -> full MXU throughput for
        # bf16 inputs; accumulation is always f32.
        x = x_ref[...]                                              # (TM, Hp)
        h = jnp.dot(x, w1_ref[...], preferred_element_type=jnp.float32)
        h = h + b1_ref[...].astype(jnp.float32)                     # (TM, Hp) f32

        # Exact GELU: x * 0.5 * (1 + erf(x / sqrt(2))).  Padded lanes stay exactly 0.
        h = h * 0.5 * (1.0 + jax.lax.erf(h * (1.0 / math.sqrt(2.0))))

        # TF-style LayerNorm over the *valid* H lanes only (biased variance, eps in sqrt).
        u = jnp.sum(h, axis=-1, keepdims=True) * inv_h              # padded lanes add 0
        d = h - u
        if h_valid != h_padded:
            lane = jax.lax.broadcasted_iota(jnp.int32, h.shape, dimension=1)
            d = jnp.where(lane < h_valid, d, 0.0)
        s = jnp.sum(d * d, axis=-1, keepdims=True) * inv_h
        h_ln = d * jax.lax.rsqrt(s + eps)                           # rsqrt -> EUP slot
        h_ln = (gamma_ref[...].astype(jnp.float32) * h_ln
                + beta_ref[...].astype(jnp.float32))

        # Output projection: cast back to the MXU operand dtype, accumulate in f32.
        y = jnp.dot(h_ln.astype(w2_ref.dtype), w2_ref[...],
                    preferred_element_type=jnp.float32)
        y = y + b2_ref[...].astype(jnp.float32)

        out_ref[...] = y.astype(out_ref.dtype)
        hid_ref[...] = h_ln.astype(hid_ref.dtype)

    return kernel


def spec_prediction_head(hidden_states, params, *, tile_rows=None, eps=1e-12):
    """hidden_states: (B, T, H). Weights stored as (in, out) == torch weight.T.

    Returns (linear_output (B, T, D), hidden_states_out (B, T, H))."""
    B, T, H = hidden_states.shape
    dtype = hidden_states.dtype
    w1, b1 = params["w1"], params["b1"]
    gamma, beta = params["gamma"], params["beta"]
    w2, b2 = params["w2"], params["b2"]
    D = w2.shape[1]

    N = B * T
    if tile_rows is None:
        tile_rows = _default_tile_rows()
    # Keep the row tile sublane-aligned and avoid over-padding tiny inputs.
    tile_rows = max(8, min(int(tile_rows), _round_up(N, 8)))

    Hp = _round_up(H, 128)          # lane-dense hidden dim (full MXU K/N)
    Dp = _round_up(D, 128)          # lane-dense output dim (unmasked stores)
    Np = _round_up(N, tile_rows)    # ragged rows handled by padding

    x2d = jnp.pad(hidden_states.reshape(N, H), ((0, Np - N), (0, Hp - H)))
    # Weights in the input dtype: bf16 in -> bf16 MXU operands, f32 accumulation.
    w1p = jnp.pad(w1, ((0, Hp - H), (0, Hp - H))).astype(dtype)
    w2p = jnp.pad(w2, ((0, Hp - H), (0, Dp - D))).astype(dtype)
    # Small per-feature vectors stay f32 for the f32 elementwise path.
    b1p = jnp.pad(b1.astype(jnp.float32), (0, Hp - H)).reshape(1, Hp)
    gammap = jnp.pad(gamma.astype(jnp.float32), (0, Hp - H)).reshape(1, Hp)
    betap = jnp.pad(beta.astype(jnp.float32), (0, Hp - H)).reshape(1, Hp)
    b2p = jnp.pad(b2.astype(jnp.float32), (0, Dp - D)).reshape(1, Dp)

    grid = (Np // tile_rows,)

    # Rough VMEM budget: double-buffered row tiles + resident weights + f32 headroom.
    isz = jnp.dtype(dtype).itemsize
    est = (2 * tile_rows * (2 * Hp + Dp) * isz        # x, hid, out tiles (x2 buffers)
           + 2 * (Hp * Hp + Hp * Dp) * isz            # W1, W2 (x2 buffers)
           + 2 * (3 * Hp + Dp) * 4                    # biases / LN params
           + 6 * tile_rows * (Hp + Dp) * 4)           # f32 intermediates headroom
    vmem_limit = int(min(64 * 2 ** 20, max(2 * est, 32 * 2 ** 20)))

    kernel = _make_spec_head_kernel(H, Hp, float(eps))

    out_p, hid_p = pl.pallas_call(
        kernel,
        out_shape=(
            jax.ShapeDtypeStruct((Np, Dp), dtype),
            jax.ShapeDtypeStruct((Np, Hp), dtype),
        ),
        grid_spec=pltpu.PrefetchScalarGridSpec(
            num_scalar_prefetch=0,
            grid=grid,
            in_specs=[
                pl.BlockSpec((tile_rows, Hp), lambda i: (i, 0)),   # x rows
                pl.BlockSpec((Hp, Hp), lambda i: (0, 0)),          # W1 (constant index)
                pl.BlockSpec((1, Hp), lambda i: (0, 0)),           # b1
                pl.BlockSpec((1, Hp), lambda i: (0, 0)),           # gamma
                pl.BlockSpec((1, Hp), lambda i: (0, 0)),           # beta
                pl.BlockSpec((Hp, Dp), lambda i: (0, 0)),          # W2 (constant index)
                pl.BlockSpec((1, Dp), lambda i: (0, 0)),           # b2
            ],
            out_specs=[
                pl.BlockSpec((tile_rows, Dp), lambda i: (i, 0)),
                pl.BlockSpec((tile_rows, Hp), lambda i: (i, 0)),
            ],
        ),
        compiler_params=pltpu.CompilerParams(
            dimension_semantics=("parallel",),   # row axis shards across v7x's 2 TCs
            vmem_limit_bytes=vmem_limit,
        ),
    )(x2d, w1p, b1p, gammap, betap, w2p, b2p)

    out = out_p[:N, :D].reshape(B, T, D)
    hid = hid_p[:N, :H].reshape(B, T, H)
    return out, hid


def _reference(hidden_states, params):
    """Pure-JAX f32 reference of the PyTorch forward, for correctness checks."""
    x = hidden_states.astype(jnp.float32)
    h = x @ params["w1"].astype(jnp.float32) + params["b1"].astype(jnp.float32)
    h = h * 0.5 * (1.0 + jax.lax.erf(h / math.sqrt(2.0)))
    u = jnp.mean(h, axis=-1, keepdims=True)
    s = jnp.mean((h - u) ** 2, axis=-1, keepdims=True)
    h = (h - u) / jnp.sqrt(s + 1e-12)
    h = params["gamma"].astype(jnp.float32) * h + params["beta"].astype(jnp.float32)
    y = h @ params["w2"].astype(jnp.float32) + params["b2"].astype(jnp.float32)
    return y, h


if __name__ == "__main__":
    def make_params(key, H, D):
        kw1, kb1, kw2, kb2, kg, kb = jax.random.split(key, 6)
        return {
            "w1": jax.random.normal(kw1, (H, H), jnp.float32) * (1.0 / math.sqrt(H)),
            "b1": jax.random.normal(kb1, (H,), jnp.float32) * 0.02,
            "gamma": 1.0 + 0.1 * jax.random.normal(kg, (H,), jnp.float32),
            "beta": 0.1 * jax.random.normal(kb, (H,), jnp.float32),
            "w2": jax.random.normal(kw2, (H, D), jnp.float32) * (1.0 / math.sqrt(H)),
            "b2": jax.random.normal(kb2, (D,), jnp.float32) * 0.02,
        }

    def run_case(name, B, T, H, D, dtype, atol, rtol):
        key = jax.random.PRNGKey(0)
        kx, kp = jax.random.split(key)
        params = make_params(kp, H, D)
        x = jax.random.normal(kx, (B, T, H), jnp.float32).astype(dtype)

        y, h = spec_prediction_head(x, params)
        y, h = jax.block_until_ready((y, h))
        assert y.shape == (B, T, D) and h.shape == (B, T, H), f"{name}: bad shapes"

        ref_params = dict(params)
        if dtype == jnp.bfloat16:
            # The kernel feeds bf16 weights to the MXU; compare against the same quantization.
            ref_params["w1"] = params["w1"].astype(jnp.bfloat16).astype(jnp.float32)
            ref_params["w2"] = params["w2"].astype(jnp.bfloat16).astype(jnp.float32)
        y_ref, h_ref = _reference(x.astype(jnp.float32), ref_params)

        assert jnp.allclose(y.astype(jnp.float32), y_ref, atol=atol, rtol=rtol), \
            f"{name}: linear_output mismatch"
        assert jnp.allclose(h.astype(jnp.float32), h_ref, atol=atol, rtol=rtol), \
            f"{name}: hidden_states mismatch"

    # Small shapes consistent with the module (batch=2, seq=8, hidden=32, output_dim=64),
    # exercising (1) the padded-lane path (H, D < 128), (2) the lane-aligned path, and
    # (3) the bf16-operand / f32-accumulate MXU path.
    run_case("f32_padded_lanes", B=2, T=8, H=32, D=64, dtype=jnp.float32, atol=1e-4, rtol=1e-4)
    run_case("f32_lane_aligned", B=1, T=16, H=128, D=128, dtype=jnp.float32, atol=1e-4, rtol=1e-4)
    run_case("bf16_mxu_operands", B=2, T=8, H=32, D=64, dtype=jnp.bfloat16, atol=5e-2, rtol=5e-2)

    print("KERNEL_OK")
</pallas_src>

<mosaic_0001>
module attributes {stable_mosaic.version = 11 : i64} {
  func.func @kernel(%arg0: i32, %arg1: memref<16x128xf32, #tpu.memory_space<vmem>>, %arg2: memref<128x128xf32, #tpu.memory_space<vmem>>, %arg3: memref<1x128xf32, #tpu.memory_space<vmem>>, %arg4: memref<1x128xf32, #tpu.memory_space<vmem>>, %arg5: memref<1x128xf32, #tpu.memory_space<vmem>>, %arg6: memref<128x128xf32, #tpu.memory_space<vmem>>, %arg7: memref<1x128xf32, #tpu.memory_space<vmem>>, %arg8: memref<16x128xf32, #tpu.memory_space<vmem>>, %arg9: memref<16x128xf32, #tpu.memory_space<vmem>>) attributes {dimension_semantics = [#tpu.dimension_semantics<parallel>], iteration_bounds = array<i64: 1>, scalar_prefetch = 0 : i64, scratch_operands = 0 : i64, tpu.core_type = #tpu.core_type<tc>, window_params = [{transform_indices = @transform_0, window_bounds = array<i64: 16, 128>}, {pipeline_mode = #tpu.pipeline_mode<synchronous>, transform_indices = @transform_1, window_bounds = array<i64: 128, 128>}, {pipeline_mode = #tpu.pipeline_mode<synchronous>, transform_indices = @transform_2, window_bounds = array<i64: 1, 128>}, {pipeline_mode = #tpu.pipeline_mode<synchronous>, transform_indices = @transform_3, window_bounds = array<i64: 1, 128>}, {pipeline_mode = #tpu.pipeline_mode<synchronous>, transform_indices = @transform_4, window_bounds = array<i64: 1, 128>}, {pipeline_mode = #tpu.pipeline_mode<synchronous>, transform_indices = @transform_5, window_bounds = array<i64: 128, 128>}, {pipeline_mode = #tpu.pipeline_mode<synchronous>, transform_indices = @transform_6, window_bounds = array<i64: 1, 128>}, {transform_indices = @transform_7, window_bounds = array<i64: 16, 128>}, {transform_indices = @transform_8, window_bounds = array<i64: 16, 128>}]} {
    %c0 = arith.constant 0 : index
    %c0_0 = arith.constant 0 : index
    %0 = vector.load %arg1[%c0, %c0_0] : memref<16x128xf32, #tpu.memory_space<vmem>>, vector<16x128xf32>
    %c0_1 = arith.constant 0 : index
    %c0_2 = arith.constant 0 : index
    %1 = vector.load %arg2[%c0_1, %c0_2] : memref<128x128xf32, #tpu.memory_space<vmem>>, vector<128x128xf32>
    %cst = arith.constant dense<0.000000e+00> : vector<16x128xf32>
    %2 = tpu.matmul %0, %1, %cst {dimension_numbers = #tpu.dot_dimension_numbers<[1], [0], [0], [1], [0, 0, 1, 1], [], []>} : vector<16x128xf32>, vector<128x128xf32>, vector<16x128xf32> -> vector<16x128xf32>
    %c0_3 = arith.constant 0 : index
    %c0_4 = arith.constant 0 : index
    %3 = vector.load %arg3[%c0_3, %c0_4] : memref<1x128xf32, #tpu.memory_space<vmem>>, vector<1x128xf32>
    %4 = vector.broadcast %3 : vector<1x128xf32> to vector<16x128xf32>
    %5 = arith.addf %2, %4 : vector<16x128xf32>
    %cst_5 = arith.constant 5.000000e-01 : f32
    %6 = vector.broadcast %cst_5 : f32 to vector<16x128xf32>
    %7 = arith.mulf %5, %6 : vector<16x128xf32>
    %cst_6 = arith.constant 0.707106769 : f32
    %8 = vector.broadcast %cst_6 : f32 to vector<16x128xf32>
    %9 = arith.mulf %5, %8 : vector<16x128xf32>
    %10 = math.erf %9 : vector<16x128xf32>
    %cst_7 = arith.constant 1.000000e+00 : f32
    %11 = vector.broadcast %cst_7 : f32 to vector<16x128xf32>
    %12 = arith.addf %11, %10 : vector<16x128xf32>
    %13 = arith.mulf %7, %12 : vector<16x128xf32>
    %cst_8 = arith.constant dense<0.000000e+00> : vector<16xf32>
    %14 = vector.multi_reduction <add>, %13, %cst_8 [1] : vector<16x128xf32> to vector<16xf32>
    %15 = vector.shape_cast %14 : vector<16xf32> to vector<16x1xf32>
    %cst_9 = arith.constant 3.125000e-02 : f32
    %16 = vector.broadcast %cst_9 : f32 to vector<16x1xf32>
    %17 = arith.mulf %15, %16 : vector<16x1xf32>
    %18 = vector.broadcast %17 : vector<16x1xf32> to vector<16x128xf32>
    %19 = arith.subf %13, %18 : vector<16x128xf32>
    %20 = tpu.iota {dimensions = array<i32: 1>} : vector<16x128xi32>
    %c32_i32 = arith.constant 32 : i32
    %21 = vector.broadcast %c32_i32 : i32 to vector<16x128xi32>
    %22 = arith.cmpi slt, %20, %21 : vector<16x128xi32>
    %cst_10 = arith.constant 0.000000e+00 : f32
    %23 = vector.broadcast %cst_10 : f32 to vector<16x128xf32>
    %24 = arith.select %22, %19, %23 : vector<16x128xi1>, vector<16x128xf32>
    %25 = arith.mulf %24, %24 : vector<16x128xf32>
    %cst_11 = arith.constant dense<0.000000e+00> : vector<16xf32>
    %26 = vector.multi_reduction <add>, %25, %cst_11 [1] : vector<16x128xf32> to vector<16xf32>
    %27 = vector.shape_cast %26 : vector<16xf32> to vector<16x1xf32>
    %cst_12 = arith.constant 3.125000e-02 : f32
    %28 = vector.broadcast %cst_12 : f32 to vector<16x1xf32>
    %29 = arith.mulf %27, %28 : vector<16x1xf32>
    %cst_13 = arith.constant 9.99999996E-13 : f32
    %30 = vector.broadcast %cst_13 : f32 to vector<16x1xf32>
    %31 = arith.addf %29, %30 : vector<16x1xf32>
    %32 = math.rsqrt %31 : vector<16x1xf32>
    %33 = vector.broadcast %32 : vector<16x1xf32> to vector<16x128xf32>
    %34 = arith.mulf %24, %33 : vector<16x128xf32>
    %c0_14 = arith.constant 0 : index
    %c0_15 = arith.constant 0 : index
    %35 = vector.load %arg4[%c0_14, %c0_15] : memref<1x128xf32, #tpu.memory_space<vmem>>, vector<1x128xf32>
    %36 = vector.broadcast %35 : vector<1x128xf32> to vector<16x128xf32>
    %37 = arith.mulf %36, %34 : vector<16x128xf32>
    %c0_16 = arith.constant 0 : index
    %c0_17 = arith.constant 0 : index
    %38 = vector.load %arg5[%c0_16, %c0_17] : memref<1x128xf32, #tpu.memory_space<vmem>>, vector<1x128xf32>
    %39 = vector.broadcast %38 : vector<1x128xf32> to vector<16x128xf32>
    %40 = arith.addf %37, %39 : vector<16x128xf32>
    %c0_18 = arith.constant 0 : index
    %c0_19 = arith.constant 0 : index
    %41 = vector.load %arg6[%c0_18, %c0_19] : memref<128x128xf32, #tpu.memory_space<vmem>>, vector<128x128xf32>
    %cst_20 = arith.constant dense<0.000000e+00> : vector<16x128xf32>
    %42 = tpu.matmul %40, %41, %cst_20 {dimension_numbers = #tpu.dot_dimension_numbers<[1], [0], [0], [1], [0, 0, 1, 1], [], []>} : vector<16x128xf32>, vector<128x128xf32>, vector<16x128xf32> -> vector<16x128xf32>
    %c0_21 = arith.constant 0 : index
    %c0_22 = arith.constant 0 : index
    %43 = vector.load %arg7[%c0_21, %c0_22] : memref<1x128xf32, #tpu.memory_space<vmem>>, vector<1x128xf32>
    %44 = vector.broadcast %43 : vector<1x128xf32> to vector<16x128xf32>
    %45 = arith.addf %42, %44 : vector<16x128xf32>
    %c0_23 = arith.constant 0 : index
    %c0_24 = arith.constant 0 : index
    %46 = vector.load %arg8[%c0_23, %c0_24] : memref<16x128xf32, #tpu.memory_space<vmem>>, vector<16x128xf32>
    tpu.vector_store %arg8[%c0_23, %c0_24], %45 {strides = array<i32>} : memref<16x128xf32, #tpu.memory_space<vmem>>, vector<16x128xf32>,
    %c0_25 = arith.constant 0 : index
    %c0_26 = arith.constant 0 : index
    %47 = vector.load %arg9[%c0_25, %c0_26] : memref<16x128xf32, #tpu.memory_space<vmem>>, vector<16x128xf32>
    tpu.vector_store %arg9[%c0_25, %c0_26], %40 {strides = array<i32>} : memref<16x128xf32, #tpu.memory_space<vmem>>, vector<16x128xf32>,
    return
  }
  func.func @transform_0(%arg0: i32) -> (i32, i32) {
    %c0_i32 = arith.constant 0 : i32
    %c0_i32_0 = arith.constant 0 : i32
    return %arg0, %c0_i32 : i32, i32
  }
  func.func @transform_1(%arg0: i32) -> (i32, i32) {
    %c0_i32 = arith.constant 0 : i32
    %c0_i32_0 = arith.constant 0 : i32
    %c0_i32_1 = arith.constant 0 : i32
    return %c0_i32, %c0_i32_0 : i32, i32
  }
  func.func @transform_2(%arg0: i32) -> (i32, i32) {
    %c0_i32 = arith.constant 0 : i32
    %c0_i32_0 = arith.constant 0 : i32
    %c0_i32_1 = arith.constant 0 : i32
    return %c0_i32, %c0_i32_0 : i32, i32
  }
  func.func @transform_3(%arg0: i32) -> (i32, i32) {
    %c0_i32 = arith.constant 0 : i32
    %c0_i32_0 = arith.constant 0 : i32
    %c0_i32_1 = arith.constant 0 : i32
    return %c0_i32, %c0_i32_0 : i32, i32
  }
  func.func @transform_4(%arg0: i32) -> (i32, i32) {
    %c0_i32 = arith.constant 0 : i32
    %c0_i32_0 = arith.constant 0 : i32
    %c0_i32_1 = arith.constant 0 : i32
    return %c0_i32, %c0_i32_0 : i32, i32
  }
  func.func @transform_5(%arg0: i32) -> (i32, i32) {
    %c0_i32 = arith.constant 0 : i32
    %c0_i32_0 = arith.constant 0 : i32
    %c0_i32_1 = arith.constant 0 : i32
    return %c0_i32, %c0_i32_0 : i32, i32
  }
  func.func @transform_6(%arg0: i32) -> (i32, i32) {
    %c0_i32 = arith.constant 0 : i32
    %c0_i32_0 = arith.constant 0 : i32
    %c0_i32_1 = arith.constant 0 : i32
    return %c0_i32, %c0_i32_0 : i32, i32
  }
  func.func @transform_7(%arg0: i32) -> (i32, i32) {
    %c0_i32 = arith.constant 0 : i32
    %c0_i32_0 = arith.constant 0 : i32
    return %arg0, %c0_i32 : i32, i32
  }
  func.func @transform_8(%arg0: i32) -> (i32, i32) {
    %c0_i32 = arith.constant 0 : i32
    %c0_i32_0 = arith.constant 0 : i32
    return %arg0, %c0_i32 : i32, i32
  }
}

</mosaic_0001>

<bundles_post_ra>
// kernel: tpu_custom_call.1
= control target key start
LH: loop header
LB: loop body
LE: loop exit
PB: predicated region body
PF: predicated region fallthrough
CT: control target
= control target key end

     0   :  { %14 = vsyncpa [#allocation3], 0  ;;  %s655_s0 = inlined_call_operand.hbm [shape: f32[16,128], index: 0, kind: input, shape index: {}]   ;;  %s656_s1 = inlined_call_operand.hbm [shape: f32[128,128], index: 1, kind: input, shape index: {}]   ;;  %s657_s2 = inlined_call_operand.vmem [shape: f32[1,128], index: 2, kind: input, shape index: {}]   ;;  %s658_s3 = inlined_call_operand.vmem [shape: f32[1,128], index: 3, kind: input, shape index: {}]   ;;  %s659_s4 = inlined_call_operand.vmem [shape: f32[1,128], index: 4, kind: input, shape index: {}]   ;;  %s660_s5 = inlined_call_operand.hbm [shape: f32[128,128], index: 5, kind: input, shape index: {}]   ;;  %s661_s6 = inlined_call_operand.vmem [shape: f32[1,128], index: 6, kind: input, shape index: {}]   ;;  %s662_s7 = inlined_call_operand.hbm [shape: f32[16,128], index: 7, kind: output, shape index: {0}]   ;;  %s663_s8 = inlined_call_operand.hbm [shape: f32[16,128], index: 8, kind: output, shape index: {1}]  }
   0x1   :  { %15 = vsyncpa [#allocation6], 0 }
   0x2   :  { %16 = vsyncpa [#allocation4], 0 }
   0x3   :  { %17 = vsyncpa [#allocation10], 0  ;;  %s35_s29 = sshll.u32 %s656_s1, 4  ;;  %s533_s30 = smov [#allocation5]   ;;  %s36_s29 = int_to_ptr.hbm [resolvable:$true] %s35_s29 }
   0x4   :  { %s37_s9 = sshll.u32 %s533_s30, 4  ;;  %s22_s12 = sshll.u32 %s655_s0, 4  ;;  %s38_s9 = int_to_ptr.vmem [resolvable:$true] %s37_s9  ;;  %s23_s12 = int_to_ptr.hbm [resolvable:$true] %s22_s12 }
   0x5   :  { %s534_s13 = smov 128   ;;  %s535_s14 = smov 8  }
   0x6   :  { %43 = dma.hbm_to_vmem [thread:$0]  %s36_s29, 2048, %s38_s9, [#allocation6], %s534_s13, %s534_s13, %s535_s14  }
   0x7   :  { %s536_s15 = smov [#allocation2]   ;;  %s54_s1 = sshll.u32 %s660_s5, 4  ;;  %s55_s1 = int_to_ptr.hbm [resolvable:$true] %s54_s1 }
   0x8   :  { %s24_s16 = sshll.u32 %s536_s15, 4  ;;  %s537_s0 = smov [#allocation7]   ;;  %s25_s16 = int_to_ptr.vmem [resolvable:$true] %s24_s16 }
   0x9   :  { %30 = dma.hbm_to_vmem [thread:$0]  %s23_s12, 256, %s25_s16, [#allocation3], %s534_s13, %s534_s13, %s535_s14  }
   0xa   :  { %s56_s19 = sshll.u32 %s537_s0, 4  ;;  %s57_s19 = int_to_ptr.vmem [resolvable:$true] %s56_s19 }
   0xb   :  { %62 = dma.hbm_to_vmem [thread:$0]  %s55_s1, 2048, %s57_s19, [#allocation6], %s534_s13, %s534_s13, %s535_s14  }
   0xc   :  { %525 = dma.done.wait [#allocation3], 256  }
   0xd   :  { %526 = vsyncadd [#allocation3], 4294967040 }
   0xe   :  { %527 = dma.done.wait [#allocation6], 4096  }
   0xf   :  { %528 = vsyncadd [#allocation6], 4294963200  ;;  %v94_v0 = vld [vmem:[#allocation5 + $0x78] sm:$0xff]  ;;  %v93_v1 = vld [vmem:[#allocation5 + $0x70] sm:$0xff]  ;;  %s333_s26 = sshll.u32 %s663_s8, 4  ;;  %s539_s29 = smov [#allocation8]   ;;  %s334_s26 = int_to_ptr.hbm [resolvable:$true] %s333_s26 }
  0x10   :  { %99 = vmatpush.msra.mxu0 %v94_v0  ;;  %354 = vmatpush.msra.mxu2 %v94_v0  ;;  %v92_v2 = vld [vmem:[#allocation5 + $0x68] sm:$0xff]  ;;  %v91_v3 = vld [vmem:[#allocation5 + $0x60] sm:$0xff]  ;;  %v90_v4 = vld [vmem:[#allocation5 + $0x58] sm:$0xff]  ;;  %s318_s30 = sshll.u32 %s539_s29, 4  ;;  %s320_s11 = sshll.u32 %s662_s7, 4  ;;  %s319_s30 = int_to_ptr.vmem [resolvable:$true] %s318_s30  ;;  %s321_s11 = int_to_ptr.hbm [resolvable:$true] %s320_s11 }
  0x11   :  { %v89_v5 = vld [vmem:[#allocation5 + $0x50] sm:$0xff]  ;;  %v88_v6 = vld [vmem:[#allocation5 + $0x48] sm:$0xff]  ;;  %v87_v7 = vld [vmem:[#allocation5 + $0x40] sm:$0xff] }
  0x12   :  { %100 = vmatpush.msra.mxu0 %v93_v1  ;;  %355 = vmatpush.msra.mxu2 %v93_v1  ;;  %v86_v8 = vld [vmem:[#allocation5 + $0x38] sm:$0xff]  ;;  %v85_v9 = vld [vmem:[#allocation5 + $0x30] sm:$0xff]  ;;  %v84_v10 = vld [vmem:[#allocation5 + $0x28] sm:$0xff] }
  0x13   :  { %v83_v11 = vld [vmem:[#allocation5 + $0x20] sm:$0xff]  ;;  %v82_v12 = vld [vmem:[#allocation5 + $0x18] sm:$0xff]  ;;  %v81_v13 = vld [vmem:[#allocation5 + $0x10] sm:$0xff] }
  0x14   :  { %101 = vmatpush.msra.mxu0 %v92_v2  ;;  %356 = vmatpush.msra.mxu2 %v92_v2  ;;  %v80_v14 = vld [vmem:[#allocation5 + $0x8] sm:$0xff]  ;;  %v79_v15 = vld [vmem:[#allocation5] sm:$0xff]  ;;  %v77_v16 = vld [vmem:[#allocation2] sm:$0xff] }
  0x15   :  { %v78_v17 = vld [vmem:[#allocation2 + $0x8] sm:$0xff]  ;;  %v393_v18 = vld [vmem:[%s657_s2] ss:$0 sm:$0xff] }
  0x16   :  { %102 = vmatpush.msra.mxu0 %v91_v3  ;;  %357 = vmatpush.msra.mxu2 %v91_v3 }
  0x18   :  { %103 = vmatpush.msra.mxu0 %v90_v4  ;;  %358 = vmatpush.msra.mxu2 %v90_v4 }
  0x1a   :  { %104 = vmatpush.msra.mxu0 %v89_v5  ;;  %359 = vmatpush.msra.mxu2 %v89_v5 }
  0x1c   :  { %105 = vmatpush.msra.mxu0 %v88_v6  ;;  %360 = vmatpush.msra.mxu2 %v88_v6 }
  0x1e   :  { %106 = vmatpush.msra.mxu0 %v87_v7  ;;  %361 = vmatpush.msra.mxu2 %v87_v7 }
  0x20   :  { %107 = vmatpush.msra.mxu0 %v86_v8  ;;  %362 = vmatpush.msra.mxu2 %v86_v8 }
  0x22   :  { %108 = vmatpush.msra.mxu0 %v85_v9  ;;  %363 = vmatpush.msra.mxu2 %v85_v9 }
  0x24   :  { %109 = vmatpush.msra.mxu0 %v84_v10  ;;  %364 = vmatpush.msra.mxu2 %v84_v10 }
  0x26   :  { %110 = vmatpush.msra.mxu0 %v83_v11  ;;  %365 = vmatpush.msra.mxu2 %v83_v11 }
  0x28   :  { %111 = vmatpush.msra.mxu0 %v82_v12  ;;  %366 = vmatpush.msra.mxu2 %v82_v12 }
  0x2a   :  { %112 = vmatpush.msra.mxu0 %v81_v13  ;;  %367 = vmatpush.msra.mxu2 %v81_v13 }
  0x2c   :  { %113 = vmatpush.msra.mxu0 %v80_v14  ;;  %368 = vmatpush.msra.mxu2 %v80_v14 }
  0x2e   :  { %114 = vmatpush.msra.mxu0 %v79_v15  ;;  %369 = vmatpush.msra.mxu2 %v79_v15 }
  0x2f   :  { %115 = vmatmul.f32.vlgmr.msra.gmra.mxu0 %v77_v16  ;;  %118 = vmatmul.f32.vlgmr.msra.gmra.mxu2 %v78_v17 }
  0xac   :  { %v116_v19 = vpop.f32.mrf.mxu0 }
  0xad   :  { %v606_v20 = vadd.f32 %v393_v18, %v116_v19 }
  0xaf   :  { %v609_v21 = vmul.f32 0.70710677, %v606_v20 }
  0xb1   :  { %v126_v22 = vmul.f32 %v609_v21, %v609_v21 }
  0xb2   :  { %v119_v23 = vpop.f32.mrf.mxu2 }
  0xb3   :  { %v127_v24 = vmin.f32 %v126_v22, 16.0  ;;  %v613_v25 = vadd.f32 %v393_v18, %v119_v23 }
  0xb5   :  { %v616_v26 = vmul.f32 0.70710677, %v613_v25  ;;  %v139_v27 = vmul.f32 3.8918573e-05, %v127_v24  ;;  %v128_v29 = vmul.f32 2.1237322e-06, %v127_v24 }
  0xb7   :  { %v166_v28 = vmul.f32 %v616_v26, %v616_v26  ;;  %v140_v30 = vadd.f32 0.001143296, %v139_v27  ;;  %v129_v35 = vadd.f32 0.00028619796, %v128_v29 }
  0xb9   :  { %v167_v31 = vmin.f32 %v166_v28, 16.0  ;;  %v141_v32 = vmul.f32 %v140_v30, %v127_v24  ;;  %v130_v42 = vmul.f32 %v129_v35, %v127_v24 }
  0xbb   :  { %v168_v33 = vmul.f32 2.1237322e-06, %v167_v31  ;;  %v179_v34 = vmul.f32 3.8918573e-05, %v167_v31  ;;  %v142_v36 = vadd.f32 0.014752088, %v141_v32 }
  0xbc   :  { %v131_v48 = vadd.f32 0.0036580483, %v130_v42 }
  0xbd   :  { %v169_v37 = vadd.f32 0.00028619796, %v168_v33  ;;  %v180_v38 = vadd.f32 0.001143296, %v179_v34  ;;  %v143_v39 = vmul.f32 %v142_v36, %v127_v24  ;;  %v123_v34 = vmul.f32 0.5, %v613_v25 }
  0xbe   :  { %v132_v54 = vmul.f32 %v131_v48, %v127_v24 }
  0xbf   :  { %v170_v40 = vmul.f32 %v169_v37, %v167_v31  ;;  %v181_v41 = vmul.f32 %v180_v38, %v167_v31  ;;  %v144_v43 = vadd.f32 0.112945676, %v143_v39  ;;  %v122_v39 = vmul.f32 0.5, %v606_v20 }
  0xc0   :  { %v133_v59 = vadd.f32 0.05243302, %v132_v54  ;;  %v277_v54 = vld [vmem:[#allocation7 + $0x50] sm:$0xff] }
  0xc1   :  { %v182_v44 = vadd.f32 0.014752088, %v181_v41  ;;  %v171_v45 = vadd.f32 0.0036580483, %v170_v40  ;;  %v145_v46 = vmul.f32 %v144_v43, %v127_v24  ;;  %v282_v40 = vld [vmem:[#allocation7 + $0x78] sm:$0xff]  ;;  %v281_v41 = vld [vmem:[#allocation7 + $0x70] sm:$0xff] }
  0xc2   :  { %v134_v63 = vmul.f32 %v133_v59, %v127_v24  ;;  %370 = vmatpush.msra.mxu3 %v282_v40  ;;  %287 = vmatpush.msra.mxu1 %v282_v40  ;;  %v272_v59 = vld [vmem:[#allocation7 + $0x28] sm:$0xff] }
  0xc3   :  { %v183_v47 = vmul.f32 %v182_v44, %v167_v31  ;;  %v146_v49 = vadd.f32 0.4994258, %v145_v46  ;;  %v172_v51 = vmul.f32 %v171_v45, %v167_v31 }
  0xc4   :  { %v135_v3 = vadd.f32 0.18741608, %v134_v63  ;;  %371 = vmatpush.msra.mxu3 %v281_v41  ;;  %288 = vmatpush.msra.mxu1 %v281_v41  ;;  %v268_v63 = vld [vmem:[#allocation7 + $0x8] sm:$0xff] }
  0xc5   :  { %v184_v50 = vadd.f32 0.112945676, %v183_v47  ;;  %v147_v52 = vmul.f32 %v146_v49, %v127_v24  ;;  %v173_v57 = vadd.f32 0.05243302, %v172_v51  ;;  %v280_v51 = vld [vmem:[#allocation7 + $0x68] sm:$0xff] }
  0xc6   :  { %v136_v8 = vmul.f32 %v135_v3, %v127_v24  ;;  %372 = vmatpush.msra.mxu3 %v280_v51  ;;  %289 = vmatpush.msra.mxu1 %v280_v51 }
  0xc7   :  { %v185_v53 = vmul.f32 %v184_v50, %v167_v31  ;;  %v148_v55 = vadd.f32 1.0, %v147_v52  ;;  %v174_v61 = vmul.f32 %v173_v57, %v167_v31  ;;  %v279_v52 = vld [vmem:[#allocation7 + $0x60] sm:$0xff]  ;;  %v274_v57 = vld [vmem:[#allocation7 + $0x38] sm:$0xff] }
  0xc8   :  { %v137_v17 = vadd.f32 1.1283791, %v136_v8  ;;  %373 = vmatpush.msra.mxu3 %v279_v52  ;;  %290 = vmatpush.msra.mxu1 %v279_v52 }
  0xc9   :  { %v186_v56 = vadd.f32 0.4994258, %v185_v53  ;;  %397 = vrcp.f32 %v148_v55  ;;  %v175_v1 = vadd.f32 0.18741608, %v174_v61  ;;  %vm154_vm1 = vweird.f32 %v148_v55  ;;  %v278_v53 = vld [vmem:[#allocation7 + $0x58] sm:$0xff] }
  0xca   :  { %v158_v12 = vand.u32 2147483647, %v148_v55  ;;  %v160_v13 = vand.u32 2147483648, %v148_v55  ;;  %v138_v30 = vmul.f32 %v137_v17, %v609_v21  ;;  %v218_v21 = vlaneseq  ;;  %374 = vmatpush.msra.mxu3 %v278_v53  ;;  %291 = vmatpush.msra.mxu1 %v278_v53  ;;  %v270_v61 = vld [vmem:[#allocation7 + $0x18] sm:$0xff] }
  0xcb   :  { %v187_v58 = vmul.f32 %v186_v56, %v167_v31  ;;  %v176_v6 = vmul.f32 %v175_v1, %v167_v31  ;;  %v275_v56 = vld [vmem:[#allocation7 + $0x40] sm:$0xff] }
  0xcc   :  { %v161_v23 = vor.u32 1.1754944e-38, %v160_v13  ;;  %vm159_vm7 = vcmp.eq.f32.partialorder %v158_v12, 8.507059e+37  ;;  %v219_v42 = vand.u32 127, %v218_v21  ;;  %375 = vmatpush.msra.mxu3 %v277_v54  ;;  %292 = vmatpush.msra.mxu1 %v277_v54 }
  0xcd   :  { %v188_v60 = vadd.f32 1.0, %v187_v58  ;;  %v177_v14 = vadd.f32 1.1283791, %v176_v6  ;;  %v273_v58 = vld [vmem:[#allocation7 + $0x30] sm:$0xff] }
  0xce   :  { %vm220_vm8 = vcmp.lt.s32.totalorder %v219_v42, 32 }
  0xcf   :  { %399 = vrcp.f32 %v188_v60  ;;  %v398_v62 = vpop.eup %397  ;;  %v200_v11 = vand.u32 2147483648, %v188_v60  ;;  %v198_v16 = vand.u32 2147483647, %v188_v60  ;;  %vm194_vm4 = vweird.f32 %v188_v60 }
  0xd0   :  { %v150_v0 = vmul.f32 %v398_v62, %v148_v55  ;;  %vm155_vm0 = vweird.f32 %v398_v62  ;;  %v178_v24 = vmul.f32 %v177_v14, %v616_v26  ;;  %v276_v55 = vld [vmem:[#allocation7 + $0x48] sm:$0xff] }
  0xd1   :  { %vm156_vm3 = vmor %vm154_vm1, %vm155_vm0  ;;  %v201_v22 = vor.u32 1.1754944e-38, %v200_v11  ;;  %vm199_vm6 = vcmp.eq.f32.partialorder %v198_v16, 8.507059e+37  ;;  %376 = vmatpush.msra.mxu3 %v276_v55  ;;  %293 = vmatpush.msra.mxu1 %v276_v55 }
  0xd2   :  { %v151_v2 = vsub.f32 1.0, %v150_v0  ;;  %v267_v0 = vld [vmem:[#allocation7] sm:$0xff] }
  0xd3   :  { %377 = vmatpush.msra.mxu3 %v275_v56  ;;  %294 = vmatpush.msra.mxu1 %v275_v56 }
  0xd4   :  { %v152_v5 = vmul.f32 %v398_v62, %v151_v2 }
  0xd5   :  { %v400_v4 = vpop.eup %399  ;;  %378 = vmatpush.msra.mxu3 %v274_v57  ;;  %295 = vmatpush.msra.mxu1 %v274_v57 }
  0xd6   :  { %v190_v7 = vmul.f32 %v400_v4, %v188_v60  ;;  %v153_v10 = vadd.f32 %v398_v62, %v152_v5  ;;  %vm195_vm2 = vweird.f32 %v400_v4  ;;  %v271_v60 = vld [vmem:[#allocation7 + $0x20] sm:$0xff] }
  0xd7   :  { %vm196_vm5 = vmor %vm194_vm4, %vm195_vm2  ;;  %379 = vmatpush.msra.mxu3 %v273_v58  ;;  %296 = vmatpush.msra.mxu1 %v273_v58 }
  0xd8   :  { %v191_v9 = vsub.f32 1.0, %v190_v7  ;;  %v157_v19 = vsel %vm156_vm3, %v398_v62, %v153_v10  ;;  %v269_v62 = vld [vmem:[#allocation7 + $0x10] sm:$0xff] }
  0xd9   :  { %v162_v29 = vsel %vm159_vm7, %v161_v23, %v157_v19  ;;  %380 = vmatpush.msra.mxu3 %v272_v59  ;;  %297 = vmatpush.msra.mxu1 %v272_v59  ;;  %v395_v19 = vld [vmem:[%s659_s4] ss:$0 sm:$0xff] }
  0xda   :  { %v192_v15 = vmul.f32 %v400_v4, %v191_v9  ;;  %v163_v33 = vmul.f32 %v162_v29, %v138_v30 }
  0xdb   :  { %381 = vmatpush.msra.mxu3 %v271_v60  ;;  %298 = vmatpush.msra.mxu1 %v271_v60 }
  0xdc   :  { %v193_v18 = vadd.f32 %v400_v4, %v192_v15  ;;  %v352_v37 = vclamps-f32 %v163_v33, 1.0  ;;  %v394_v15 = vld [vmem:[%s658_s3] ss:$0 sm:$0xff]  ;;  %s538_s3 = smov [#allocation9]  }
  0xdd   :  { %382 = vmatpush.msra.mxu3 %v270_v61  ;;  %299 = vmatpush.msra.mxu1 %v270_v61  ;;  %s331_s24 = sshll.u32 %s538_s3, 4  ;;  %v396_v33 = vld [vmem:[%s661_s6] ss:$0 sm:$0xff]  ;;  %s332_s24 = int_to_ptr.vmem [resolvable:$true] %s331_s24 }
  0xde   :  { %v197_v27 = vsel %vm196_vm5, %v400_v4, %v193_v18  ;;  %v206_v38 = vadd.f32 1.0, %v352_v37 }
  0xdf   :  { %v202_v28 = vsel %vm199_vm6, %v201_v22, %v197_v27  ;;  %383 = vmatpush.msra.mxu3 %v269_v62  ;;  %300 = vmatpush.msra.mxu1 %v269_v62 }
  0xe0   :  { %v203_v31 = vmul.f32 %v202_v28, %v178_v24  ;;  %v208_v26 = vmul.f32 %v206_v38, %v122_v39 }
  0xe1   :  { %384 = vmatpush.msra.mxu3 %v268_v63  ;;  %301 = vmatpush.msra.mxu1 %v268_v63 }
  0xe2   :  { %v353_v32 = vclamps-f32 %v203_v31, 1.0 }
  0xe3   :  { %385 = vmatpush.msra.mxu3 %v267_v0  ;;  %302 = vmatpush.msra.mxu1 %v267_v0 }
  0xe4   :  { %v207_v35 = vadd.f32 1.0, %v353_v32 }
  0xe6   :  { %v209_v36 = vmul.f32 %v207_v35, %v123_v34 }
  0xe8   :  { %212 = vadd.xlane.f32.xlu0 %v209_v36 }
  0xf0   :  { %210 = vadd.xlane.f32.xlu0 %v208_v26 }
 0x15b   :  { %v213_v43 = vpop.xlane.xlu0 %212 }
 0x15c   :  { %v215_v44 = vmul.f32 0.03125, %v213_v43 }
 0x15e   :  { %v217_v25 = vsub.f32 %v209_v36, %v215_v44 }
 0x160   :  { %v624_v45 = vsel %vm220_vm8, %v217_v25, 0.0 }
 0x161   :  { %v224_v46 = vmul.f32 %v624_v45, %v624_v45 }
 0x163   :  { %227 = vadd.xlane.f32.xlu1 %v224_v46  ;;  %v211_v20 = vpop.xlane.xlu0 %210 }
 0x164   :  { %v214_v47 = vmul.f32 0.03125, %v211_v20 }
 0x166   :  { %v216_v48 = vsub.f32 %v208_v26, %v214_v47 }
 0x168   :  { %v628_v49 = vsel %vm220_vm8, %v216_v48, 0.0 }
 0x169   :  { %v223_v50 = vmul.f32 %v628_v49, %v628_v49 }
 0x16b   :  { %225 = vadd.xlane.f32.xlu1 %v223_v50 }
 0x1d6   :  { %v228_v1 = vpop.xlane.xlu1 %227 }
 0x1d7   :  { %v230_v2 = vmul.f32 0.03125, %v228_v1 }
 0x1d9   :  { %v232_v3 = vadd.f32 1e-12, %v230_v2 }
 0x1db   :  { %401 = vrsqrt.f32 %v232_v3  ;;  %vm249_vm10 = vweird.f32 %v232_v3 }
 0x1de   :  { %v226_v4 = vpop.xlane.xlu1 %225 }
 0x1df   :  { %v229_v5 = vmul.f32 0.03125, %v226_v4 }
 0x1e1   :  { %v402_v6 = vpop.eup %401  ;;  %v231_v7 = vadd.f32 1e-12, %v229_v5 }
 0x1e2   :  { %v244_v8 = vmul.f32 %v402_v6, %v232_v3  ;;  %vm250_vm9 = vweird.f32 %v402_v6 }
 0x1e3   :  { %403 = vrsqrt.f32 %v231_v7  ;;  %vm251_vm11 = vmor %vm249_vm10, %vm250_vm9  ;;  %vm239_vm13 = vweird.f32 %v231_v7 }
 0x1e4   :  { %v245_v9 = vmul.f32 %v402_v6, %v244_v8 }
 0x1e6   :  { %v246_v10 = vmul.f32 0.5, %v245_v9 }
 0x1e8   :  { %v247_v11 = vsub.f32 1.5, %v246_v10 }
 0x1e9   :  { %v404_v12 = vpop.eup %403 }
 0x1ea   :  { %v248_v13 = vmul.f32 %v402_v6, %v247_v11  ;;  %v234_v14 = vmul.f32 %v404_v12, %v231_v7  ;;  %vm240_vm12 = vweird.f32 %v404_v12 }
 0x1eb   :  { %vm241_vm14 = vmor %vm239_vm13, %vm240_vm12 }
 0x1ec   :  { %v235_v16 = vmul.f32 %v404_v12, %v234_v14  ;;  %v252_v17 = vsel %vm251_vm11, %v402_v6, %v248_v13 }
 0x1ed   :  { %v254_v18 = vmul.f32 %v252_v17, %v624_v45 }
 0x1ee   :  { %v236_v22 = vmul.f32 0.5, %v235_v16 }
 0x1ef   :  { %v260_v23 = vmul.f32 %v394_v15, %v254_v18 }
 0x1f0   :  { %v237_v24 = vsub.f32 1.5, %v236_v22 }
 0x1f1   :  { %v266_v27 = vadd.f32 %v395_v19, %v260_v23 }
 0x1f2   :  { %v238_v28 = vmul.f32 %v404_v12, %v237_v24 }
 0x1f3   :  { %306 = vmatmul.f32.vlgmr.msra.gmra.mxu3 %v266_v27  ;;  %313 = vst [vmem:[#allocation9 + $0x8] sm:$0xff] %v266_v27 }
 0x1f4   :  { %v242_v29 = vsel %vm241_vm14, %v404_v12, %v238_v28 }
 0x1f5   :  { %v253_v30 = vmul.f32 %v242_v29, %v628_v49 }
 0x1f7   :  { %v259_v31 = vmul.f32 %v394_v15, %v253_v30 }
 0x1f9   :  { %v265_v32 = vadd.f32 %v395_v19, %v259_v31 }
 0x1fb   :  { %303 = vmatmul.f32.vlgmr.msra.gmra.mxu1 %v265_v32  ;;  %312 = vst [vmem:[#allocation9] sm:$0xff] %v265_v32 }
 0x1fc   :  { %339 = dma.vmem_to_hbm [thread:$0]  %s332_s24, 256, %s334_s26, [#allocation10], %s534_s13, %s534_s13, %s535_s14  }
 0x276   :  { %v307_v34 = vpop.f32.mrf.mxu3 }
 0x277   :  { %v308_v35 = vadd.f32 %v396_v33, %v307_v34 }
 0x278   :  { %v304_v36 = vpop.f32.mrf.mxu1 }
 0x279   :  { %311 = vst [vmem:[#allocation8 + $0x8] sm:$0xff] %v308_v35  ;;  %v305_v37 = vadd.f32 %v396_v33, %v304_v36 }
 0x27b   :  { %310 = vst [vmem:[#allocation8] sm:$0xff] %v305_v37 }
 0x27c   :  { %326 = dma.vmem_to_hbm [thread:$0]  %s319_s30, 256, %s321_s11, [#allocation4], %s534_s13, %s534_s13, %s535_s14  }
 0x27d   :  { %529 = dma.done.wait [#allocation4], 256  }
 0x27e   :  { %530 = vsyncadd [#allocation4], 4294967040 }
 0x27f   :  { %531 = dma.done.wait [#allocation10], 256  }
 0x280   :  { %532 = vsyncadd [#allocation10], 4294967040 }
 0x281   :  { %348 = vsyncpa [#allocation3], 1 }
 0x282   :  { %349 = vsyncpa [#allocation6], 1 }
 0x283   :  { %350 = vsyncpa [#allocation4], 1 }
 0x284   :  { %351 = vsyncpa [#allocation10], 1 }

</bundles_post_ra>
